<compile_context>
chip_gen: v7x
topology: tpu7x:2x2x1
jax: 0.10.0
libtpu: 0.0.40
codegen_flags: <defaults>
</compile_context>

<pallas_src>
import math
import functools

import jax
import jax.numpy as jnp
from jax import lax
from jax.experimental import pallas as pl
from jax.experimental.pallas import tpu as pltpu


# ---------------------------------------------------------------------------
# Parameter construction (matches the PyTorch __init__ exactly).
# ---------------------------------------------------------------------------
def _build_pe_table(d_model: int, max_len: int = 5000, dtype=jnp.float32) -> jnp.ndarray:
    position = jnp.arange(max_len, dtype=jnp.float32)[:, None]                  # [L, 1]
    div_term = jnp.exp(jnp.arange(0, d_model, 2, dtype=jnp.float32)
                       * (-math.log(10000.0) / d_model))                        # [D/2]
    pe = jnp.zeros((max_len, d_model), dtype=jnp.float32)
    pe = pe.at[:, 0::2].set(jnp.sin(position * div_term))
    pe = pe.at[:, 1::2].set(jnp.cos(position * div_term))
    return pe.astype(dtype)


# ---------------------------------------------------------------------------
# Kernels.  x tiles are 2-D [tile_s, B*D]; pe tiles are [tile_s, D] and get
# repeated along lanes (jnp.tile) to match the flattened (b*D + d) layout.
# ---------------------------------------------------------------------------
def _posenc_eval_kernel(x_ref, pe_ref, o_ref, *, n_rep: int):
    dt = x_ref.dtype
    o_ref[...] = x_ref[...] + jnp.tile(pe_ref[...].astype(dt), (1, n_rep))


def _posenc_train_kernel(seed_ref, x_ref, pe_ref, o_ref, *,
                         n_rep: int, n_cols: int, tile_s: int, p: float):
    dt = x_ref.dtype
    y = x_ref[...] + jnp.tile(pe_ref[...].astype(dt), (1, n_rep))

    # --- counter-based hash RNG (portable: plain integer jnp ops) -----------
    base = (pl.program_id(0) * tile_s).astype(jnp.uint32)
    rows = lax.broadcasted_iota(jnp.int32, y.shape, 0).astype(jnp.uint32) + base
    cols = lax.broadcasted_iota(jnp.int32, y.shape, 1).astype(jnp.uint32)
    h = rows * jnp.uint32(n_cols) + cols                  # unique element counter
    h = h ^ (seed_ref[0].astype(jnp.uint32) * jnp.uint32(0x9E3779B9))
    # murmur3 fmix32
    h = h ^ (h >> 16)
    h = h * jnp.uint32(0x85EBCA6B)
    h = h ^ (h >> 13)
    h = h * jnp.uint32(0xC2B2AE35)
    h = h ^ (h >> 16)

    # Inverted dropout: drop with prob p, scale survivors by 1/(1-p).
    thresh = jnp.uint32(min(int(p * 4294967296.0), 0xFFFFFFFF))
    keep = (h >= thresh).astype(dt) * jnp.asarray(1.0 / (1.0 - p), dt)
    o_ref[...] = y * keep


# ---------------------------------------------------------------------------
# Tiling choice: biggest multiple-of-8 row count that divides S and keeps the
# x tile around <= 2 MiB (double-buffered in + out + pe stays well under every
# generation's scoped-VMEM budget, incl. v7x's 64 MiB / v5e's 16 MiB default).
# ---------------------------------------------------------------------------
_TILE_BYTES_BUDGET = 2 * 1024 * 1024


def _choose_tile_s(S: int, row_bytes: int) -> int:
    if S % 8 != 0:
        return S                      # odd/small seq len -> single full block
    t = (_TILE_BYTES_BUDGET // max(row_bytes, 1)) // 8 * 8
    t = max(8, min(t, S))
    while S % t != 0:                 # terminate at t == 8 (divides S)
        t -= 8
    return t


# ---------------------------------------------------------------------------
# Wrapper.
# ---------------------------------------------------------------------------
def positional_encoding(x: jnp.ndarray,
                        pe_table: jnp.ndarray,
                        *,
                        p: float = 0.1,
                        train: bool = False,
                        seed: int = 0) -> jnp.ndarray:
    """x: [seq_len, batch, d_model]; pe_table: [max_len, d_model]."""
    S, B, D = x.shape
    assert pe_table.shape[1] == D and pe_table.shape[0] >= S
    BD = B * D

    x2 = x.reshape(S, BD)             # free row-major reshape -> lane-dense view

    tile_s = _choose_tile_s(S, BD * x.dtype.itemsize)
    if S % 8 != 0:
        # Fallback single-block path needs the pe sublane dim == full array dim.
        pe_in = pe_table[:S]
    else:
        pe_in = pe_table              # no wrapper slice; index_map picks the rows
    grid = (S // tile_s,)

    cparams = pltpu.CompilerParams(
        dimension_semantics=("parallel",),        # independent tiles -> both v7x TCs
        vmem_limit_bytes=32 * 1024 * 1024,
    )
    out_shape = jax.ShapeDtypeStruct((S, BD), x.dtype)

    if train and p > 0.0:
        kernel = functools.partial(_posenc_train_kernel,
                                   n_rep=B, n_cols=BD, tile_s=tile_s, p=float(p))
        seed_arr = jnp.asarray([seed], dtype=jnp.int32)
        out2 = pl.pallas_call(
            kernel,
            out_shape=out_shape,
            grid_spec=pltpu.PrefetchScalarGridSpec(
                num_scalar_prefetch=1,
                grid=grid,
                in_specs=[pl.BlockSpec((tile_s, BD), lambda i, s: (i, 0)),
                          pl.BlockSpec((tile_s, D), lambda i, s: (i, 0))],
                out_specs=pl.BlockSpec((tile_s, BD), lambda i, s: (i, 0)),
            ),
            compiler_params=cparams,
        )(seed_arr, x2, pe_in)
    else:
        kernel = functools.partial(_posenc_eval_kernel, n_rep=B)
        out2 = pl.pallas_call(
            kernel,
            out_shape=out_shape,
            grid=grid,
            in_specs=[pl.BlockSpec((tile_s, BD), lambda i: (i, 0)),
                      pl.BlockSpec((tile_s, D), lambda i: (i, 0))],
            out_specs=pl.BlockSpec((tile_s, BD), lambda i: (i, 0)),
            compiler_params=cparams,
        )(x2, pe_in)

    return out2.reshape(S, B, D)


# ---------------------------------------------------------------------------
# Demo / self-test.
# ---------------------------------------------------------------------------
if __name__ == "__main__":
    key = jax.random.PRNGKey(0)
    seq_len, batch, d_model = 8, 2, 32
    x = jax.random.normal(key, (seq_len, batch, d_model), dtype=jnp.float32)

    pe_table = _build_pe_table(d_model, max_len=5000)

    # Eval-mode forward (dropout is identity) vs. plain-JAX reference.
    out = positional_encoding(x, pe_table, p=0.1, train=False)
    out = jax.block_until_ready(out)
    ref = x + pe_table[:seq_len][:, None, :]
    assert out.shape == (seq_len, batch, d_model)
    assert jnp.allclose(out, ref, atol=1e-6, rtol=1e-6)

    # Train-mode forward: exercises the in-kernel dropout path.  Every output
    # element must be either 0 (dropped) or the kept, 1/(1-p)-scaled value.
    drop_p = 0.1
    out_train = positional_encoding(x, pe_table, p=drop_p, train=True, seed=42)
    out_train = jax.block_until_ready(out_train)
    assert out_train.shape == (seq_len, batch, d_model)
    scaled = ref / (1.0 - drop_p)
    ok = jnp.isclose(out_train, scaled, atol=1e-5) | (out_train == 0.0)
    assert bool(jnp.all(ok))

    print("KERNEL_OK")
</pallas_src>

<mosaic_0001>
module attributes {stable_mosaic.version = 11 : i64} {
  func.func @_posenc_eval_kernel(%arg0: i32, %arg1: memref<8x64xf32, #tpu.memory_space<vmem>>, %arg2: memref<8x32xf32, #tpu.memory_space<vmem>>, %arg3: memref<8x64xf32, #tpu.memory_space<vmem>>) attributes {dimension_semantics = [#tpu.dimension_semantics<parallel>], iteration_bounds = array<i64: 1>, scalar_prefetch = 0 : i64, scratch_operands = 0 : i64, tpu.core_type = #tpu.core_type<tc>, window_params = [{transform_indices = @transform_0, window_bounds = array<i64: 8, 64>}, {transform_indices = @transform_1, window_bounds = array<i64: 8, 32>}, {transform_indices = @transform_2, window_bounds = array<i64: 8, 64>}]} {
    %c0 = arith.constant 0 : index
    %c0_0 = arith.constant 0 : index
    %0 = vector.load %arg1[%c0, %c0_0] : memref<8x64xf32, #tpu.memory_space<vmem>>, vector<8x64xf32>
    %c0_1 = arith.constant 0 : index
    %c0_2 = arith.constant 0 : index
    %1 = vector.load %arg2[%c0_1, %c0_2] : memref<8x32xf32, #tpu.memory_space<vmem>>, vector<8x32xf32>
    %2 = tpu.concatenate %1, %1 in 1 : vector<8x32xf32>, vector<8x32xf32> -> vector<8x64xf32>
    %3 = arith.addf %0, %2 : vector<8x64xf32>
    %c0_3 = arith.constant 0 : index
    %c0_4 = arith.constant 0 : index
    %4 = vector.load %arg3[%c0_3, %c0_4] : memref<8x64xf32, #tpu.memory_space<vmem>>, vector<8x64xf32>
    tpu.vector_store %arg3[%c0_3, %c0_4], %3 {strides = array<i32>} : memref<8x64xf32, #tpu.memory_space<vmem>>, vector<8x64xf32>,
    return
  }
  func.func @transform_0(%arg0: i32) -> (i32, i32) {
    %c0_i32 = arith.constant 0 : i32
    %c0_i32_0 = arith.constant 0 : i32
    return %arg0, %c0_i32 : i32, i32
  }
  func.func @transform_1(%arg0: i32) -> (i32, i32) {
    %c0_i32 = arith.constant 0 : i32
    %c0_i32_0 = arith.constant 0 : i32
    return %arg0, %c0_i32 : i32, i32
  }
  func.func @transform_2(%arg0: i32) -> (i32, i32) {
    %c0_i32 = arith.constant 0 : i32
    %c0_i32_0 = arith.constant 0 : i32
    return %arg0, %c0_i32 : i32, i32
  }
}

</mosaic_0001>

<bundles_post_ra>
// kernel: tpu_custom_call.1
= control target key start
LH: loop header
LB: loop body
LE: loop exit
PB: predicated region body
PF: predicated region fallthrough
CT: control target
= control target key end

     0   :  { %s98_s0 = inlined_call_operand.vmem [shape: f32[8,64], index: 0, kind: input, shape index: {}]   ;;  %s99_s1 = inlined_call_operand.vmem [shape: f32[5000,32], index: 1, kind: input, shape index: {}]   ;;  %s100_s2 = inlined_call_operand.hbm [shape: f32[8,64], index: 2, kind: output, shape index: {}]  }
   0x1   :  { %v13_v0 = vld [vmem:[%s99_s1] sm:$0xff] }
   0x2   :  { %7 = vsyncpa [#allocation3], 0  ;;  %s63_s11 = smov 32   ;;  %vm18_vm0 = vcmask 261120   ;;  %v12_v1 = vld [vmem:[%s98_s0] sm:$0xff]  ;;  %s64_s14 = smov [#allocation2]  }
   0x3   :  { %15 = vrot.lane.b32.xlu0 %v13_v0, %s63_s11  ;;  %s29_s15 = sshll.u32 %s64_s14, 4  ;;  %vm21_vm1 = vcmask 523264   ;;  %s30_s15 = int_to_ptr.vmem [resolvable:$true] %s29_s15 }
   0x4   :  { %s39_s16 = scalar_lea.vmem %s30_s15, 128  ;;  %p44_p1 = scmp.lt.s32.totalorder %s30_s15, %s30_s15 }
   0x5   :  { %p40_p0 = scmp.ne.s32.totalorder %s30_s15, %s39_s16  ;;  %p45_p2 = scmp.lt.s32.totalorder %s39_s16, %s39_s16 }
   0x7   :  { %p46_p3 = por %p45_p2, %p44_p1 }
   0x9   :  { %p47_p4 = pnand %p46_p3, %p40_p0 }
  0x75   :  { %v16_v2 = vpop.permute.xlu0 %15 }
  0x76   :  { %v19_v3 = vsel %vm18_vm0, %v13_v0, %v16_v2 }
  0x77   :  { %v20_v4 = vadd.f32 %v19_v3, %v12_v1 }
  0x79   :  { %22 = vst.msk [vmem:[#allocation2] sm:$0xff] %vm21_vm1, %v20_v4 }
  0x7a   :  { %50 = shalt.err (!%p47_p4)
}
  0x7b   :  { %s51_s18 = scalar_lea.hbm %s100_s2, 128 }
  0x7c   :  { %p52_p5 = scmp.ne.s32.totalorder %s100_s2, %s51_s18  ;;  %p55_p6 = scmp.lt.u32.totalorder %s51_s18, %s100_s2 }
  0x7e   :  { %p57_p7 = pnand %p55_p6, %p52_p5 }
  0x80   :  { %60 = shalt.err (!%p57_p7)
}
  0x81   :  { %32 = dma.vmem_to_hbm [thread:$0]  %s30_s15, 128, %s100_s2, [#allocation3]  }
  0x82   :  { %61 = dma.done.wait [#allocation3], 128  }
  0x83   :  { %62 = vsyncadd [#allocation3], 4294967168 }
  0x84   :  { %36 = vsyncpa [#allocation3], 1 }

</bundles_post_ra>
